<compile_context>
chip_gen: v6e
topology: v6e:2x2x1
jax: 0.10.0
libtpu: 0.0.40
codegen_flags: <defaults>
</compile_context>

<pallas_src>
import functools

import jax
import jax.numpy as jnp
from jax.experimental import pallas as pl
from jax.experimental.pallas import tpu as pltpu

LATENT_DIMS = 32
HIDDEN = 112
OUT = 2000
OUT_PAD = 2048          # weight padded 2000 -> 2048 for lane-dense MXU tiles
DEFAULT_TILE_B = 1024   # batch tile (multiple of 8); ~17 MB VMEM double-buffered


def _round_up(x, m):
    return (x + m - 1) // m * m


def _choose_tiles(batch, tile_b):
    """Pad the batch to a sublane multiple (8) and pick a batch tile.

    Prefers the largest tile (<= tile_b, multiple of 8) that divides the
    8-aligned batch exactly (zero wasted rows: every padded row is a
    full-price ~8 KB HBM write in this write-bound kernel); otherwise picks
    the tile minimizing padded rows, tie-breaking on the larger tile so the
    ~0.35 us/grid-step overhead stays amortized.
    """
    b8 = _round_up(batch, 8)
    if b8 <= tile_b:
        # Split big single-block batches in two so v7x's second TensorCore
        # gets work via dimension_semantics=("parallel",).
        if b8 > 512 and b8 % 16 == 0:
            return b8, b8 // 2
        return b8, b8
    candidates = [u * 8 for u in range(tile_b // 8, 0, -1)]
    exact = [tb for tb in candidates if b8 % tb == 0]
    if exact and exact[0] * 2 >= tile_b:
        return b8, exact[0]
    tb = min(candidates, key=lambda t: (_round_up(b8, t), -t))
    return _round_up(b8, tb), tb


def _decoder_kernel(z_ref, w_ref, b_ref, o_ref):
    # z_ref: (TILE_B, 32)     VMEM (batch-tiled, double-buffered)
    # w_ref: (32, 2048)       VMEM (resident across grid steps)
    # b_ref: (1, 2048) f32    VMEM (resident)
    # o_ref: (TILE_B, 2000)   VMEM (batch-tiled) -- real, unpadded output width
    z = z_ref[...]
    w = w_ref[...]
    if z.dtype != w.dtype:
        z = z.astype(w.dtype)      # bf16-weight option: bf16 x bf16 -> f32 acc
    y = jnp.dot(z, w, preferred_element_type=jnp.float32)          # (tb, 2048)
    r = jnp.maximum(y + b_ref[...], 0.0)                           # fp32 bias+ReLU
    # Narrow only at the store: 15 unmasked lane tiles + 1 masked 80-lane tail.
    o_ref[...] = r[:, :OUT].astype(o_ref.dtype)


def fuse_decoder_params(w1, b1, w2, b2, weight_dtype=jnp.float32):
    """Fuse the two linears (valid: no activation between them); pad 2000->2048.

    w1: (32, 112), b1: (112,), w2: (112, 2000), b2: (2000,)
    Returns w_fused: (32, 2048) in `weight_dtype`, b_fused: (1, 2048) fp32.
    weight_dtype=jnp.bfloat16 keeps the v7x matmul cleanly HBM-bound but will
    loosen accuracy vs. an fp32 reference.
    """
    w_fused = w1.astype(jnp.float32) @ w2.astype(jnp.float32)             # (32, 2000)
    b_fused = b1.astype(jnp.float32) @ w2.astype(jnp.float32) + b2.astype(jnp.float32)
    w_fused = jnp.pad(w_fused, ((0, 0), (0, OUT_PAD - OUT))).astype(weight_dtype)
    b_fused = jnp.pad(b_fused, (0, OUT_PAD - OUT)).reshape(1, OUT_PAD).astype(jnp.float32)
    return w_fused, b_fused


@functools.partial(jax.jit, static_argnames=("tile_b", "out_dtype"))
def decoder_forward(z, w_fused, b_fused, *, tile_b=DEFAULT_TILE_B,
                    out_dtype=jnp.float32):
    """z: (B, 32) float32 -> (B, 1, 1000, 2) in out_dtype."""
    B = z.shape[0]
    b_pad, tb = _choose_tiles(B, tile_b)
    if b_pad != B:
        z = jnp.pad(z, ((0, b_pad - B), (0, 0)))

    out_itemsize = jnp.dtype(out_dtype).itemsize
    cost = pl.CostEstimate(
        flops=2 * b_pad * LATENT_DIMS * OUT_PAD,
        transcendentals=0,
        bytes_accessed=(z.size * z.dtype.itemsize
                        + w_fused.size * w_fused.dtype.itemsize
                        + b_fused.size * b_fused.dtype.itemsize
                        + b_pad * OUT * out_itemsize),
    )

    # Double-buffered z & out tiles + (double-buffered) resident weight/bias,
    # plus a small margin.  Output block is internally lane-padded to 2048.
    vmem_bytes = (2 * tb * (LATENT_DIMS * z.dtype.itemsize + OUT_PAD * out_itemsize)
                  + 2 * (w_fused.size * w_fused.dtype.itemsize
                         + b_fused.size * b_fused.dtype.itemsize)
                  + (2 << 20))
    vmem_limit = int(min(max(32 << 20, vmem_bytes), 100 << 20))
    # (A pl.Buffered(1) pipeline_mode on the resident weight/bias would save
    #  ~264 KB more VMEM on v7x; omitted as it is negligible at this footprint.)

    out = pl.pallas_call(
        _decoder_kernel,
        out_shape=jax.ShapeDtypeStruct((b_pad, OUT), out_dtype),
        grid_spec=pltpu.PrefetchScalarGridSpec(
            num_scalar_prefetch=0,
            grid=(b_pad // tb,),
            in_specs=[
                pl.BlockSpec((tb, LATENT_DIMS), lambda i: (i, 0)),       # z: batch-tiled
                pl.BlockSpec((LATENT_DIMS, OUT_PAD), lambda i: (0, 0)),  # fused weight: resident
                pl.BlockSpec((1, OUT_PAD), lambda i: (0, 0)),            # fused bias: resident
            ],
            out_specs=pl.BlockSpec((tb, OUT), lambda i: (i, 0)),         # real 2000-wide store
        ),
        compiler_params=pltpu.CompilerParams(
            dimension_semantics=("parallel",),   # batch axis shards across v7x's 2 TCs
            vmem_limit_bytes=vmem_limit,
        ),
        cost_estimate=cost,
    )(z, w_fused, b_fused)

    if b_pad != B:
        out = out[:B]
    # reshape((-1, 1, 1000, 2)) is pure metadata.
    return out.reshape(-1, 1, 1000, 2)


def init_params(key):
    k1, k2, k3, k4 = jax.random.split(key, 4)
    # Deterministic, PyTorch-Linear-like uniform init (stored as (in, out)).
    bound1 = 1.0 / jnp.sqrt(LATENT_DIMS)
    bound2 = 1.0 / jnp.sqrt(HIDDEN)
    w1 = jax.random.uniform(k1, (LATENT_DIMS, HIDDEN), jnp.float32, -bound1, bound1)
    b1 = jax.random.uniform(k2, (HIDDEN,), jnp.float32, -bound1, bound1)
    w2 = jax.random.uniform(k3, (HIDDEN, OUT), jnp.float32, -bound2, bound2)
    b2 = jax.random.uniform(k4, (OUT,), jnp.float32, -bound2, bound2)
    return w1, b1, w2, b2


if __name__ == "__main__":
    key = jax.random.PRNGKey(0)
    k_params, k_z = jax.random.split(key)
    w1, b1, w2, b2 = init_params(k_params)

    # Fuse + pad once (in a real model this happens at load time, not per call).
    w_fused, b_fused = fuse_decoder_params(w1, b1, w2, b2)

    def reference(zz):
        return jnp.maximum((zz @ w1 + b1) @ w2 + b2, 0.0).reshape(-1, 1, 1000, 2)

    # Small-shape check (single grid step).
    B = 8
    z = jax.random.normal(k_z, (B, LATENT_DIMS), jnp.float32)
    y = jax.block_until_ready(decoder_forward(z, w_fused, b_fused))
    assert y.shape == (B, 1, 1000, 2)
    assert jnp.allclose(y, reference(z), atol=1e-3, rtol=1e-3)

    # Exercise the multi-step grid + batch-padding path (B=20 -> pad to 24, tile 8).
    B2 = 20
    z2 = jax.random.normal(jax.random.PRNGKey(1), (B2, LATENT_DIMS), jnp.float32)
    y2 = jax.block_until_ready(decoder_forward(z2, w_fused, b_fused, tile_b=8))
    assert y2.shape == (B2, 1, 1000, 2)
    assert jnp.allclose(y2, reference(z2), atol=1e-3, rtol=1e-3)

    print("KERNEL_OK")
</pallas_src>

<mosaic_0001>
module attributes {stable_mosaic.version = 11 : i64} {
  func.func @_decoder_kernel(%arg0: i32, %arg1: memref<8x32xf32, #tpu.memory_space<vmem>>, %arg2: memref<32x2048xf32, #tpu.memory_space<vmem>>, %arg3: memref<1x2048xf32, #tpu.memory_space<vmem>>, %arg4: memref<8x2000xf32, #tpu.memory_space<vmem>>) attributes {dimension_semantics = [#tpu.dimension_semantics<parallel>], iteration_bounds = array<i64: 1>, scalar_prefetch = 0 : i64, scratch_operands = 0 : i64, tpu.core_type = #tpu.core_type<tc>, window_params = [{transform_indices = @transform_0, window_bounds = array<i64: 8, 32>}, {pipeline_mode = #tpu.pipeline_mode<synchronous>, transform_indices = @transform_1, window_bounds = array<i64: 32, 2048>}, {pipeline_mode = #tpu.pipeline_mode<synchronous>, transform_indices = @transform_2, window_bounds = array<i64: 1, 2048>}, {transform_indices = @transform_3, window_bounds = array<i64: 8, 2000>}]} {
    %c0 = arith.constant 0 : index
    %c0_0 = arith.constant 0 : index
    %0 = vector.load %arg1[%c0, %c0_0] : memref<8x32xf32, #tpu.memory_space<vmem>>, vector<8x32xf32>
    %c0_1 = arith.constant 0 : index
    %c0_2 = arith.constant 0 : index
    %1 = vector.load %arg2[%c0_1, %c0_2] : memref<32x2048xf32, #tpu.memory_space<vmem>>, vector<32x2048xf32>
    %cst = arith.constant dense<0.000000e+00> : vector<8x2048xf32>
    %2 = tpu.matmul %0, %1, %cst {dimension_numbers = #tpu.dot_dimension_numbers<[1], [0], [0], [1], [0, 0, 1, 1], [], []>} : vector<8x32xf32>, vector<32x2048xf32>, vector<8x2048xf32> -> vector<8x2048xf32>
    %c0_3 = arith.constant 0 : index
    %c0_4 = arith.constant 0 : index
    %3 = vector.load %arg3[%c0_3, %c0_4] : memref<1x2048xf32, #tpu.memory_space<vmem>>, vector<1x2048xf32>
    %4 = vector.broadcast %3 : vector<1x2048xf32> to vector<8x2048xf32>
    %5 = arith.addf %2, %4 : vector<8x2048xf32>
    %cst_5 = arith.constant 0.000000e+00 : f32
    %6 = vector.broadcast %cst_5 : f32 to vector<8x2048xf32>
    %7 = arith.maximumf %5, %6 : vector<8x2048xf32>
    %8 = vector.extract_strided_slice %7 {offsets = [0, 0], sizes = [8, 2000], strides = [1, 1]} : vector<8x2048xf32> to vector<8x2000xf32>
    %c0_6 = arith.constant 0 : index
    %c0_7 = arith.constant 0 : index
    %9 = vector.load %arg4[%c0_6, %c0_7] : memref<8x2000xf32, #tpu.memory_space<vmem>>, vector<8x2000xf32>
    tpu.vector_store %arg4[%c0_6, %c0_7], %8 {strides = array<i32>} : memref<8x2000xf32, #tpu.memory_space<vmem>>, vector<8x2000xf32>,
    return
  }
  func.func @transform_0(%arg0: i32) -> (i32, i32) {
    %c0_i32 = arith.constant 0 : i32
    %c0_i32_0 = arith.constant 0 : i32
    return %arg0, %c0_i32 : i32, i32
  }
  func.func @transform_1(%arg0: i32) -> (i32, i32) {
    %c0_i32 = arith.constant 0 : i32
    %c0_i32_0 = arith.constant 0 : i32
    %c0_i32_1 = arith.constant 0 : i32
    return %c0_i32, %c0_i32_0 : i32, i32
  }
  func.func @transform_2(%arg0: i32) -> (i32, i32) {
    %c0_i32 = arith.constant 0 : i32
    %c0_i32_0 = arith.constant 0 : i32
    %c0_i32_1 = arith.constant 0 : i32
    return %c0_i32, %c0_i32_0 : i32, i32
  }
  func.func @transform_3(%arg0: i32) -> (i32, i32) {
    %c0_i32 = arith.constant 0 : i32
    %c0_i32_0 = arith.constant 0 : i32
    return %arg0, %c0_i32 : i32, i32
  }
}

</mosaic_0001>

<bundles_post_ra>
// kernel: decoder_forward.1
= control target key start
LH: loop header
LB: loop body
LE: loop exit
PB: predicated region body
PF: predicated region fallthrough
CT: control target
= control target key end

     0   :  { %8 = vsyncpa [#allocation3], 0  ;;  %s1008_s0 = inlined_call_operand.hbm [shape: f32[8,32], index: 0, kind: input, shape index: {}]   ;;  %s1009_s1 = inlined_call_operand.hbm [shape: f32[32,2048], index: 1, kind: input, shape index: {}]   ;;  %s1010_s2 = inlined_call_operand.hbm [shape: f32[1,2048], index: 2, kind: input, shape index: {}]   ;;  %s1011_s3 = inlined_call_operand.vmem [shape: f32[8,2000], index: 3, kind: output, shape index: {}]  }
   0x1   :  { %9 = vsyncpa [#allocation5], 0  ;;  %s889_s12 = smov [#allocation4]  }
   0x2   :  { %s25_s13 = sshll.u32 %s889_s12, 4  ;;  %s26_s13 = int_to_ptr.vmem [resolvable:$true] %s25_s13 }
   0x3   :  { %s833_s14 = scalar_lea.vmem %s26_s13, 8192  ;;  %p838_p1 = scmp.lt.s32.totalorder %s26_s13, %s26_s13 }
   0x4   :  { %p834_p0 = scmp.ne.s32.totalorder %s26_s13, %s833_s14  ;;  %p839_p2 = scmp.lt.s32.totalorder %s833_s14, %s833_s14 }
   0x6   :  { %p840_p3 = por %p839_p2, %p838_p1 }
   0x8   :  { %p841_p4 = pnand %p840_p3, %p834_p0 }
   0xa   :  { %844 = shalt.err (!%p841_p4)
}
   0xb   :  { %s890_s15 = smov 2048   ;;  %s891_s16 = smov 128  }
   0xc   :  { %31 = dma.hbm_to_vmem [thread:$0]  %s1009_s1, 8192, %s26_s13, [#allocation5], %s890_s15, %s890_s15, %s891_s16  }
   0xd   :  { %s892_s19 = smov [#allocation2]   ;;  %s893_s21 = smov [#allocation6]  }
   0xe   :  { %s16_s20 = sshll.u32 %s892_s19, 4  ;;  %s38_s22 = sshll.u32 %s893_s21, 4  ;;  %s17_s20 = int_to_ptr.vmem [resolvable:$true] %s16_s20  ;;  %s39_s22 = int_to_ptr.vmem [resolvable:$true] %s38_s22 }
   0xf   :  { %s853_s23 = scalar_lea.vmem %s17_s20, 128  ;;  %p858_p6 = scmp.lt.s32.totalorder %s17_s20, %s17_s20 }
  0x10   :  { %p854_p5 = scmp.ne.s32.totalorder %s17_s20, %s853_s23  ;;  %p859_p7 = scmp.lt.s32.totalorder %s853_s23, %s853_s23 }
  0x12   :  { %p860_p8 = por %p859_p7, %p858_p6 }
  0x14   :  { %p861_p9 = pnand %p860_p8, %p854_p5 }
  0x16   :  { %864 = shalt.err (!%p861_p9)
}
  0x17   :  { %19 = dma.hbm_to_vmem [thread:$0]  %s1008_s0, 128, %s17_s20, [#allocation3]  }
  0x18   :  { %s873_s26 = scalar_lea.vmem %s39_s22, 256  ;;  %p878_p11 = scmp.lt.s32.totalorder %s39_s22, %s39_s22 }
  0x19   :  { %p874_p10 = scmp.ne.s32.totalorder %s39_s22, %s873_s26  ;;  %p879_p12 = scmp.lt.s32.totalorder %s873_s26, %s873_s26 }
  0x1b   :  { %p880_p13 = por %p879_p12, %p878_p11 }
  0x1d   :  { %p881_p0 = pnand %p880_p13, %p874_p10 }
  0x1f   :  { %884 = shalt.err (!%p881_p0)
}
  0x20   :  { %41 = dma.hbm_to_vmem [thread:$0]  %s1010_s2, 256, %s39_s22, [#allocation5]  }
  0x21   :  { %885 = dma.done.wait [#allocation3], 128  }
  0x22   :  { %886 = vsyncadd [#allocation3], 4294967168 }
  0x23   :  { %887 = dma.done.wait [#allocation5], 8448  }
  0x24   :  { %888 = vsyncadd [#allocation5], 4294958848  ;;  %v894_v0 = vmov 0.0   ;;  %v101_v1 = vld [vmem:[#allocation4 + $0x188] sm:$0xff]  ;;  %v103_v2 = vld [vmem:[#allocation4 + $0x198] sm:$0xff]  ;;  %vm200_vm0 = vcmask 261120  }
  0x25   :  { %268 = vmatprep.mubr.f32.mxu0 %v894_v0  ;;  %339 = vmatprep.mubr.f32.mxu1 %v894_v0  ;;  %v100_v3 = vld [vmem:[#allocation4 + $0x180] sm:$0xff]  ;;  %v102_v4 = vld [vmem:[#allocation4 + $0x190] sm:$0xff]  ;;  %v85_v5 = vld [vmem:[#allocation4 + $0x108] sm:$0xff]  ;;  %vm803_vm1 = vcmask 654336  }
  0x26   :  { %228 = vmatprep.subr.mxu0 %v101_v1  ;;  %299 = vmatprep.subr.mxu1 %v103_v2  ;;  %v87_v6 = vld [vmem:[#allocation4 + $0x118] sm:$0xff]  ;;  %v84_v7 = vld [vmem:[#allocation4 + $0x100] sm:$0xff]  ;;  %v86_v8 = vld [vmem:[#allocation4 + $0x110] sm:$0xff] }
  0x27   :  { %229 = vmatpush1.msra.mxu0 %v100_v3  ;;  %300 = vmatpush1.msra.mxu1 %v102_v4  ;;  %v69_v9 = vld [vmem:[#allocation4 + $0x88] sm:$0xff]  ;;  %v71_v10 = vld [vmem:[#allocation4 + $0x98] sm:$0xff]  ;;  %v68_v11 = vld [vmem:[#allocation4 + $0x80] sm:$0xff]  ;;  %v120_v3 = vlaneseq }
  0x28   :  { %230 = vmatprep.subr.mxu0 %v85_v5  ;;  %301 = vmatprep.subr.mxu1 %v87_v6  ;;  %v70_v12 = vld [vmem:[#allocation4 + $0x90] sm:$0xff]  ;;  %v53_v13 = vld [vmem:[#allocation4 + $0x8] sm:$0xff]  ;;  %v55_v14 = vld [vmem:[#allocation4 + $0x18] sm:$0xff] }
  0x29   :  { %231 = vmatpush1.msra.mxu0 %v84_v7  ;;  %302 = vmatpush1.msra.mxu1 %v86_v8  ;;  %v52_v15 = vld [vmem:[#allocation4] sm:$0xff]  ;;  %v54_v16 = vld [vmem:[#allocation4 + $0x10] sm:$0xff]  ;;  %v926_v17 = vld [vmem:[#allocation2] sm:$0xff]  ;;  %v950_v4 = vshrl.u32 %v120_v3, 7 }
  0x2a   :  { %232 = vmatprep.subr.mxu0 %v69_v9  ;;  %303 = vmatprep.subr.mxu1 %v71_v10  ;;  %v105_v18 = vld [vmem:[#allocation4 + $0x1a8] sm:$0xff]  ;;  %v107_v19 = vld [vmem:[#allocation4 + $0x1b8] sm:$0xff]  ;;  %v104_v20 = vld [vmem:[#allocation4 + $0x1a0] sm:$0xff] }
  0x2b   :  { %233 = vmatpush1.msra.mxu0 %v68_v11  ;;  %304 = vmatpush1.msra.mxu1 %v70_v12  ;;  %v106_v21 = vld [vmem:[#allocation4 + $0x1b0] sm:$0xff]  ;;  %v89_v22 = vld [vmem:[#allocation4 + $0x128] sm:$0xff]  ;;  %v91_v23 = vld [vmem:[#allocation4 + $0x138] sm:$0xff]  ;;  %v122_v5 = vsub.s32 0, %v950_v4  ;;  %v130_v6 = vsub.s32 2, %v950_v4  ;;  %v126_v8 = vsub.s32 1, %v950_v4 }
  0x2c   :  { %234 = vmatprep.subr.mxu0 %v53_v13  ;;  %305 = vmatprep.subr.mxu1 %v55_v14  ;;  %v88_v24 = vld [vmem:[#allocation4 + $0x120] sm:$0xff]  ;;  %v90_v25 = vld [vmem:[#allocation4 + $0x130] sm:$0xff]  ;;  %v73_v26 = vld [vmem:[#allocation4 + $0xa8] sm:$0xff]  ;;  %v134_v9 = vsub.s32 3, %v950_v4 }
  0x2d   :  { %235 = vmatpush1.msra.mxu0 %v52_v15  ;;  %306 = vmatpush1.msra.mxu1 %v54_v16  ;;  %v75_v27 = vld [vmem:[#allocation4 + $0xb8] sm:$0xff]  ;;  %v72_v28 = vld [vmem:[#allocation4 + $0xa0] sm:$0xff]  ;;  %v74_v29 = vld [vmem:[#allocation4 + $0xb0] sm:$0xff] }
  0x2e   :  { %811 = vmatmul.mubr.msk.f32.vlgmr.msra.gmra.mxu0 %vm200_vm0, %v926_v17  ;;  %812 = vmatmul.mubr.msk.f32.vlgmr.msra.gmra.mxu1 %vm200_vm0, %v926_v17  ;;  %v57_v30 = vld [vmem:[#allocation4 + $0x28] sm:$0xff]  ;;  %v59_v31 = vld [vmem:[#allocation4 + $0x38] sm:$0xff]  ;;  %v56_v32 = vld [vmem:[#allocation4 + $0x20] sm:$0xff] }
  0x2f   :  { %370 = vmatprep.subr.mxu0 %v105_v18  ;;  %441 = vmatprep.subr.mxu1 %v107_v19  ;;  %v58_v33 = vld [vmem:[#allocation4 + $0x30] sm:$0xff]  ;;  %v109_v34 = vld [vmem:[#allocation4 + $0x1c8] sm:$0xff]  ;;  %v111_v35 = vld [vmem:[#allocation4 + $0x1d8] sm:$0xff]  ;;  %v138_v19 = vsub.s32 4, %v950_v4 }
  0x30   :  { %371 = vmatpush1.msra.mxu0 %v104_v20  ;;  %442 = vmatpush1.msra.mxu1 %v106_v21  ;;  %v108_v36 = vld [vmem:[#allocation4 + $0x1c0] sm:$0xff]  ;;  %v110_v37 = vld [vmem:[#allocation4 + $0x1d0] sm:$0xff]  ;;  %v93_v38 = vld [vmem:[#allocation4 + $0x148] sm:$0xff]  ;;  %v146_v20 = vsub.s32 6, %v950_v4 }
  0x31   :  { %372 = vmatprep.subr.mxu0 %v89_v22  ;;  %443 = vmatprep.subr.mxu1 %v91_v23  ;;  %v95_v39 = vld [vmem:[#allocation4 + $0x158] sm:$0xff]  ;;  %v92_v40 = vld [vmem:[#allocation4 + $0x140] sm:$0xff]  ;;  %v94_v41 = vld [vmem:[#allocation4 + $0x150] sm:$0xff] }
  0x32   :  { %373 = vmatpush1.msra.mxu0 %v88_v24  ;;  %444 = vmatpush1.msra.mxu1 %v90_v25  ;;  %v77_v42 = vld [vmem:[#allocation4 + $0xc8] sm:$0xff]  ;;  %v79_v43 = vld [vmem:[#allocation4 + $0xd8] sm:$0xff]  ;;  %v76_v44 = vld [vmem:[#allocation4 + $0xc0] sm:$0xff] }
  0x33   :  { %374 = vmatprep.subr.mxu0 %v73_v26  ;;  %445 = vmatprep.subr.mxu1 %v75_v27  ;;  %v78_v45 = vld [vmem:[#allocation4 + $0xd0] sm:$0xff]  ;;  %v61_v46 = vld [vmem:[#allocation4 + $0x48] sm:$0xff]  ;;  %v63_v47 = vld [vmem:[#allocation4 + $0x58] sm:$0xff]  ;;  %v142_v27 = vsub.s32 5, %v950_v4 }
  0x34   :  { %375 = vmatpush1.msra.mxu0 %v72_v28  ;;  %446 = vmatpush1.msra.mxu1 %v74_v29  ;;  %v60_v48 = vld [vmem:[#allocation4 + $0x40] sm:$0xff]  ;;  %v62_v49 = vld [vmem:[#allocation4 + $0x50] sm:$0xff]  ;;  %v113_v50 = vld [vmem:[#allocation4 + $0x1e8] sm:$0xff]  ;;  %v150_v28 = vsub.s32 7, %v950_v4 }
  0x35   :  { %376 = vmatprep.subr.mxu0 %v57_v30  ;;  %447 = vmatprep.subr.mxu1 %v59_v31  ;;  %v115_v51 = vld [vmem:[#allocation4 + $0x1f8] sm:$0xff]  ;;  %v112_v52 = vld [vmem:[#allocation4 + $0x1e0] sm:$0xff]  ;;  %v114_v53 = vld [vmem:[#allocation4 + $0x1f0] sm:$0xff] }
  0x36   :  { %377 = vmatpush1.msra.mxu0 %v56_v32  ;;  %410 = vmatprep.mubr.f32.mxu0 %v894_v0  ;;  %v97_v54 = vld [vmem:[#allocation4 + $0x168] sm:$0xff]  ;;  %v99_v55 = vld [vmem:[#allocation4 + $0x178] sm:$0xff]  ;;  %v96_v56 = vld [vmem:[#allocation4 + $0x160] sm:$0xff] }
  0x37   :  { %448 = vmatpush1.msra.mxu1 %v58_v33  ;;  %481 = vmatprep.mubr.f32.mxu1 %v894_v0  ;;  %v98_v57 = vld [vmem:[#allocation4 + $0x170] sm:$0xff]  ;;  %v81_v58 = vld [vmem:[#allocation4 + $0xe8] sm:$0xff]  ;;  %v83_v59 = vld [vmem:[#allocation4 + $0xf8] sm:$0xff] }
  0x38   :  { %813 = vmatmul.mubr.msk.f32.vlgmr.msra.gmra.mxu0 %vm200_vm0, %v926_v17  ;;  %814 = vmatmul.mubr.msk.f32.vlgmr.msra.gmra.mxu1 %vm200_vm0, %v926_v17  ;;  %v80_v60 = vld [vmem:[#allocation4 + $0xe0] sm:$0xff]  ;;  %v82_v61 = vld [vmem:[#allocation4 + $0xf0] sm:$0xff]  ;;  %v65_v62 = vld [vmem:[#allocation4 + $0x68] sm:$0xff] }
  0x39   :  { %512 = vmatprep.subr.mxu0 %v109_v34  ;;  %583 = vmatprep.subr.mxu1 %v111_v35  ;;  %v67_v63 = vld [vmem:[#allocation4 + $0x78] sm:$0xff]  ;;  %v64_v1 = vld [vmem:[#allocation4 + $0x60] sm:$0xff]  ;;  %v66_v2 = vld [vmem:[#allocation4 + $0x70] sm:$0xff] }
  0x3a   :  { %513 = vmatpush1.msra.mxu0 %v108_v36  ;;  %584 = vmatpush1.msra.mxu1 %v110_v37  ;;  %v116_v7 = vld [vmem:[#allocation6] sm:$0xff] }
  0x3b   :  { %514 = vmatprep.subr.mxu0 %v93_v38  ;;  %585 = vmatprep.subr.mxu1 %v95_v39  ;;  %v123_v10 = vrot.slane %v116_v7, %v122_v5  ;;  %v127_v11 = vrot.slane %v116_v7, %v126_v8  ;;  %v135_v12 = vrot.slane %v116_v7, %v134_v9 }
  0x3c   :  { %515 = vmatpush1.msra.mxu0 %v92_v40  ;;  %586 = vmatpush1.msra.mxu1 %v94_v41  ;;  %v139_v29 = vrot.slane %v116_v7, %v138_v19  ;;  %v147_v30 = vrot.slane %v116_v7, %v146_v20  ;;  %v143_v31 = vrot.slane %v116_v7, %v142_v27 }
  0x3d   :  { %516 = vmatprep.subr.mxu0 %v77_v42  ;;  %587 = vmatprep.subr.mxu1 %v79_v43  ;;  %v151_v32 = vrot.slane %v116_v7, %v150_v28  ;;  %v117_v43 = vld [vmem:[#allocation6 + $0x8] sm:$0xff] }
  0x3e   :  { %517 = vmatpush1.msra.mxu0 %v76_v44  ;;  %588 = vmatpush1.msra.mxu1 %v78_v45 }
  0x3f   :  { %518 = vmatprep.subr.mxu0 %v61_v46  ;;  %589 = vmatprep.subr.mxu1 %v63_v47  ;;  %v155_v46 = vrot.slane %v117_v43, %v122_v5  ;;  %v163_v47 = vrot.slane %v117_v43, %v130_v6 }
  0x40   :  { %519 = vmatpush1.msra.mxu0 %v60_v48  ;;  %552 = vmatprep.mubr.f32.mxu0 %v894_v0  ;;  %v159_v48 = vrot.slane %v117_v43, %v126_v8 }
  0x41   :  { %590 = vmatpush1.msra.mxu1 %v62_v49  ;;  %623 = vmatprep.mubr.f32.mxu1 %v894_v0  ;;  %v167_v49 = vrot.slane %v117_v43, %v134_v9 }
  0x42   :  { %815 = vmatmul.mubr.msk.f32.vlgmr.msra.gmra.mxu0 %vm200_vm0, %v926_v17  ;;  %816 = vmatmul.mubr.msk.f32.vlgmr.msra.gmra.mxu1 %vm200_vm0, %v926_v17 }
  0x43   :  { %654 = vmatprep.subr.mxu0 %v113_v50  ;;  %725 = vmatprep.subr.mxu1 %v115_v51 }
  0x44   :  { %655 = vmatpush1.msra.mxu0 %v112_v52  ;;  %726 = vmatpush1.msra.mxu1 %v114_v53 }
  0x45   :  { %656 = vmatprep.subr.mxu0 %v97_v54  ;;  %727 = vmatprep.subr.mxu1 %v99_v55 }
  0x46   :  { %657 = vmatpush1.msra.mxu0 %v96_v56  ;;  %728 = vmatpush1.msra.mxu1 %v98_v57 }
  0x47   :  { %658 = vmatprep.subr.mxu0 %v81_v58  ;;  %729 = vmatprep.subr.mxu1 %v83_v59 }
  0x48   :  { %659 = vmatpush1.msra.mxu0 %v80_v60  ;;  %730 = vmatpush1.msra.mxu1 %v82_v61 }
  0x49   :  { %660 = vmatprep.subr.mxu0 %v65_v62  ;;  %731 = vmatprep.subr.mxu1 %v67_v63  ;;  %v171_v62 = vrot.slane %v117_v43, %v138_v19  ;;  %v179_v63 = vrot.slane %v117_v43, %v146_v20 }
  0x4a   :  { %661 = vmatpush1.msra.mxu0 %v64_v1  ;;  %694 = vmatprep.mubr.f32.mxu0 %v894_v0  ;;  %v175_v1 = vrot.slane %v117_v43, %v142_v27 }
  0x4b   :  { %732 = vmatpush1.msra.mxu1 %v66_v2  ;;  %765 = vmatprep.mubr.f32.mxu1 %v894_v0  ;;  %v131_v0 = vrot.slane %v116_v7, %v130_v6  ;;  %v183_v2 = vrot.slane %v117_v43, %v150_v28 }
  0x4c   :  { %817 = vmatmul.mubr.msk.f32.vlgmr.msra.gmra.mxu0 %vm200_vm0, %v926_v17  ;;  %818 = vmatmul.mubr.msk.f32.vlgmr.msra.gmra.mxu1 %vm200_vm0, %v926_v17 }
  0xee   :  { %v270_v13 = vpop.f32.mrf.mxu0  ;;  %v341_v14 = vpop.f32.mrf.mxu1 }
  0xef   :  { %v271_v15 = vadd.f32 %v270_v13, %v123_v10  ;;  %v342_v16 = vadd.f32 %v341_v14, %v131_v0 }
  0xf0   :  { %v272_v17 = vpop.f32.mrf.mxu0  ;;  %v343_v18 = vpop.f32.mrf.mxu1 }
  0xf1   :  { %v772_v21 = vmax.f32 %v271_v15, 0.0  ;;  %v774_v22 = vmax.f32 %v342_v16, 0.0  ;;  %v273_v23 = vadd.f32 %v272_v17, %v127_v11  ;;  %v344_v24 = vadd.f32 %v343_v18, %v135_v12 }
  0xf3   :  { %788 = vst [vmem:[%s1011_s3] sm:$0xff] %v772_v21  ;;  %790 = vst [vmem:[%s1011_s3 + $0x10] sm:$0xff] %v774_v22  ;;  %v773_v25 = vmax.f32 %v273_v23, 0.0  ;;  %v775_v26 = vmax.f32 %v344_v24, 0.0 }
  0xf5   :  { %789 = vst [vmem:[%s1011_s3 + $0x8] sm:$0xff] %v773_v25  ;;  %791 = vst [vmem:[%s1011_s3 + $0x18] sm:$0xff] %v775_v26 }
  0xf8   :  { %v412_v33 = vpop.f32.mrf.mxu0  ;;  %v483_v34 = vpop.f32.mrf.mxu1 }
  0xf9   :  { %v413_v35 = vadd.f32 %v412_v33, %v139_v29  ;;  %v484_v36 = vadd.f32 %v483_v34, %v147_v30 }
  0xfa   :  { %v414_v37 = vpop.f32.mrf.mxu0  ;;  %v485_v38 = vpop.f32.mrf.mxu1 }
  0xfb   :  { %v776_v39 = vmax.f32 %v413_v35, 0.0  ;;  %v778_v40 = vmax.f32 %v484_v36, 0.0  ;;  %v415_v41 = vadd.f32 %v414_v37, %v143_v31  ;;  %v486_v42 = vadd.f32 %v485_v38, %v151_v32 }
  0xfd   :  { %792 = vst [vmem:[%s1011_s3 + $0x20] sm:$0xff] %v776_v39  ;;  %794 = vst [vmem:[%s1011_s3 + $0x30] sm:$0xff] %v778_v40  ;;  %v777_v44 = vmax.f32 %v415_v41, 0.0  ;;  %v779_v45 = vmax.f32 %v486_v42, 0.0 }
  0xff   :  { %793 = vst [vmem:[%s1011_s3 + $0x28] sm:$0xff] %v777_v44  ;;  %795 = vst [vmem:[%s1011_s3 + $0x38] sm:$0xff] %v779_v45 }
 0x102   :  { %v554_v50 = vpop.f32.mrf.mxu0  ;;  %v625_v51 = vpop.f32.mrf.mxu1 }
 0x103   :  { %v555_v52 = vadd.f32 %v554_v50, %v155_v46  ;;  %v626_v53 = vadd.f32 %v625_v51, %v163_v47 }
 0x104   :  { %v556_v54 = vpop.f32.mrf.mxu0  ;;  %v627_v55 = vpop.f32.mrf.mxu1 }
 0x105   :  { %v780_v56 = vmax.f32 %v555_v52, 0.0  ;;  %v782_v57 = vmax.f32 %v626_v53, 0.0  ;;  %v557_v58 = vadd.f32 %v556_v54, %v159_v48  ;;  %v628_v59 = vadd.f32 %v627_v55, %v167_v49 }
 0x107   :  { %796 = vst [vmem:[%s1011_s3 + $0x40] sm:$0xff] %v780_v56  ;;  %798 = vst [vmem:[%s1011_s3 + $0x50] sm:$0xff] %v782_v57  ;;  %v781_v60 = vmax.f32 %v557_v58, 0.0  ;;  %v783_v61 = vmax.f32 %v628_v59, 0.0 }
 0x109   :  { %797 = vst [vmem:[%s1011_s3 + $0x48] sm:$0xff] %v781_v60  ;;  %799 = vst [vmem:[%s1011_s3 + $0x58] sm:$0xff] %v783_v61 }
 0x10c   :  { %v696_v3 = vpop.f32.mrf.mxu0  ;;  %v767_v4 = vpop.f32.mrf.mxu1 }
 0x10d   :  { %v697_v5 = vadd.f32 %v696_v3, %v171_v62  ;;  %v768_v6 = vadd.f32 %v767_v4, %v179_v63 }
 0x10e   :  { %v698_v7 = vpop.f32.mrf.mxu0  ;;  %v769_v8 = vpop.f32.mrf.mxu1 }
 0x10f   :  { %v784_v9 = vmax.f32 %v697_v5, 0.0  ;;  %v786_v10 = vmax.f32 %v768_v6, 0.0  ;;  %v699_v0 = vadd.f32 %v698_v7, %v175_v1  ;;  %v770_v11 = vadd.f32 %v769_v8, %v183_v2 }
 0x111   :  { %800 = vst [vmem:[%s1011_s3 + $0x60] sm:$0xff] %v784_v9  ;;  %802 = vst [vmem:[%s1011_s3 + $0x70] sm:$0xff] %v786_v10  ;;  %v785_v12 = vmax.f32 %v699_v0, 0.0  ;;  %v787_v13 = vmax.f32 %v770_v11, 0.0 }
 0x113   :  { %801 = vst [vmem:[%s1011_s3 + $0x68] sm:$0xff] %v785_v12  ;;  %804 = vst.msk [vmem:[%s1011_s3 + $0x78] sm:$0xff] %vm803_vm1, %v787_v13 }
 0x114   :  { %809 = vsyncpa [#allocation3], 1 }
 0x115   :  { %810 = vsyncpa [#allocation5], 1 }

</bundles_post_ra>
